<compile_context>
chip_gen: v7x
topology: tpu7x:2x2x1
jax: 0.10.0
libtpu: 0.0.40
codegen_flags: <defaults>
</compile_context>

<pallas_src>
import functools

import jax
import jax.numpy as jnp
from jax.experimental import pallas as pl
from jax.experimental.pallas import tpu as pltpu


def _dgca_kernel(scal_ref, x_ref, p_ref, o_ref, *, use_mxu):
    # scal_ref: SMEM (3,)         [conv_mask bias, alpha (GSA), beta (GCA)]
    # x_ref:    VMEM (Bt, C, HW)  input tile, native dtype (f32 or bf16)
    # p_ref:    VMEM (5, C) f32   if use_mxu  (lane-major parameter rows)
    #           VMEM (C, 5) f32   otherwise   (sublane-major parameter columns)
    #           rows/cols: [w_mask, w_dw, b_dw, ln_g, ln_b]
    # o_ref:    VMEM (Bt, C, HW)  output tile, native dtype
    x = x_ref[...]                                # native dtype, (Bt, C, HW)
    Bt, C, HW = x.shape
    b_mask = scal_ref[0]
    alpha = scal_ref[1]
    beta = scal_ref[2]
    f32 = jnp.float32

    if use_mxu:
        # ----- MXU path (C >= 128): reductions as batched matmuls, native
        # dtype operands, f32 accumulation; per-channel math lane-major.
        w_mask = p_ref[0:1, :]                    # (1, C) f32
        w_dw = p_ref[1:2, :]
        b_dw = p_ref[2:3, :]
        ln_g = p_ref[3:4, :]
        ln_b = p_ref[4:5, :]

        # GSA logits: (Bt,1,C) @ (Bt,C,HW) -> (Bt,1,HW)
        w_b = jnp.broadcast_to(w_mask.astype(x.dtype), (Bt, 1, C))
        logits = jnp.einsum("bkc,bcs->bks", w_b, x,
                            preferred_element_type=f32) + b_mask
        m = jnp.max(logits, axis=-1, keepdims=True)
        e = jnp.exp(logits - m)
        attn_sp = e * (1.0 / jnp.sum(e, axis=-1, keepdims=True))   # (Bt,1,HW) f32

        # Fused GSA context + GCA spatial mean: one batched matmul over HW.
        rhs2 = jnp.concatenate(
            [attn_sp.astype(x.dtype), jnp.ones((Bt, 1, HW), x.dtype)], axis=1)
        red = jnp.einsum("bks,bcs->bkc", rhs2, x,
                         preferred_element_type=f32)                # (Bt,2,C)
        context = red[:, 0:1, :]                                    # (Bt,1,C)
        ctx_mean = red[:, 1:2, :] * (1.0 / HW)                      # (Bt,1,C)

        # GSA transform: depthwise 1x1 + LayerNorm over C (lane axis, dense).
        t = context * w_dw + b_dw
        mu = jnp.mean(t, axis=-1, keepdims=True)
        var = jnp.mean(jnp.square(t - mu), axis=-1, keepdims=True)
        s_att = (t - mu) * jax.lax.rsqrt(var + 1e-5) * ln_g + ln_b  # (Bt,1,C)
        s_term = alpha * jnp.swapaxes(s_att, -1, -2)                # (Bt,C,1)

        # GCA: channel softmax (lane axis) + channel-weighted sum via MXU.
        mc = jnp.max(ctx_mean, axis=-1, keepdims=True)
        ec = jnp.exp(ctx_mean - mc)
        attn_ch = ec * (1.0 / jnp.sum(ec, axis=-1, keepdims=True))  # (Bt,1,C)
        c_att = jnp.einsum("bkc,bcs->bks", attn_ch.astype(x.dtype), x,
                           preferred_element_type=f32)              # (Bt,1,HW)
        c_term = beta * c_att

        x_for_out = x.astype(f32)
    else:
        # ----- VPU path (small C): mul + reduce; f32 accumulation.
        w_mask = p_ref[:, 0:1]                    # (C, 1) f32
        w_dw = p_ref[:, 1:2]
        b_dw = p_ref[:, 2:3]
        ln_g = p_ref[:, 3:4]
        ln_b = p_ref[:, 4:5]
        xf = x.astype(f32)

        # GSA
        logits = jnp.sum(xf * w_mask, axis=1, keepdims=True) + b_mask  # (Bt,1,HW)
        m = jnp.max(logits, axis=-1, keepdims=True)
        e = jnp.exp(logits - m)
        attn_sp = e * (1.0 / jnp.sum(e, axis=-1, keepdims=True))
        context = jnp.sum(xf * attn_sp, axis=-1, keepdims=True)        # (Bt,C,1)
        t = context * w_dw + b_dw
        mu = jnp.mean(t, axis=1, keepdims=True)
        var = jnp.mean(jnp.square(t - mu), axis=1, keepdims=True)
        s_att = (t - mu) * jax.lax.rsqrt(var + 1e-5) * ln_g + ln_b
        s_term = alpha * s_att                                          # (Bt,C,1)

        # GCA
        ctx = jnp.sum(xf, axis=-1, keepdims=True) * (1.0 / HW)          # (Bt,C,1)
        mc = jnp.max(ctx, axis=1, keepdims=True)
        ec = jnp.exp(ctx - mc)
        attn_ch = ec * (1.0 / jnp.sum(ec, axis=1, keepdims=True))
        c_att = jnp.sum(xf * attn_ch, axis=1, keepdims=True)            # (Bt,1,HW)
        c_term = beta * c_att

        x_for_out = xf

    # fusion 'add': s_out + c_out = 2x + alpha*s_att + beta*c_att
    o_ref[...] = (x_for_out * 2.0 + (s_term + c_term)).astype(o_ref.dtype)


def dgca_layer(x, w_mask, b_mask, w_dw, b_dw, ln_g, ln_b, alpha, beta,
               *, max_tile_bytes=None, alias_input=False):
    B, C, H, W = x.shape
    HW = H * W
    dtype = x.dtype
    itemsize = jnp.dtype(dtype).itemsize

    # Unpadded (B, C, HW); full last-two-dim blocks => no pad / slice passes.
    x3 = x.reshape(B, C, HW)

    use_mxu = C >= 128   # route the big reductions through the MXU

    pvec = jnp.stack(
        [jnp.asarray(w_mask, jnp.float32).reshape(C),
         jnp.asarray(w_dw, jnp.float32).reshape(C),
         jnp.asarray(b_dw, jnp.float32).reshape(C),
         jnp.asarray(ln_g, jnp.float32).reshape(C),
         jnp.asarray(ln_b, jnp.float32).reshape(C)], axis=0)    # (5, C) f32
    params = pvec if use_mxu else pvec.T                        # (5,C) / (C,5)
    scal = jnp.array([b_mask, alpha, beta], dtype=jnp.float32)  # (3,) SMEM

    # --- generation-aware tile / VMEM sizing ---
    try:
        phys_vmem = int(pltpu.get_tpu_info().vmem_capacity_bytes)
    except Exception:
        phys_vmem = 64 << 20                       # conservative (v7x-sized)
    vmem_cap = min(int(phys_vmem * 0.75), 96 << 20)
    if max_tile_bytes is None:
        max_tile_bytes = (12 << 20) if phys_vmem >= (100 << 20) else (5 << 20)

    per_sample = C * HW * itemsize
    Bt = max(1, min(B, max_tile_bytes // per_sample))
    if B >= 2:
        # Keep >= 2 grid steps so ("parallel",) shards across v7x's two TCs.
        Bt = min(Bt, pl.cdiv(B, 2))
    num_steps = pl.cdiv(B, Bt)     # partial last block is safe (per-row math)
    # TODO(synk): for B == 1 with a huge (C,HW) slab, add a second parallel
    # grid axis over HW chunks (pltpu.emit_pipeline + online GSA softmax) so
    # neither TC idles and the working set fits v7x's 64 MiB VMEM.

    tile_bytes = Bt * per_sample
    f32_tile = Bt * C * HW * 4
    # 2x double-buffered input + output (native dtype) + in-kernel f32 temps.
    want = 4 * tile_bytes + (1 if use_mxu else 3) * f32_tile + (2 << 20)
    vmem_limit = int(min(max(want, 16 << 20), vmem_cap))

    cost = pl.CostEstimate(
        flops=int((8 if use_mxu else 12) * B * C * HW),
        transcendentals=int(B * (HW + C)),
        bytes_accessed=int(2 * B * C * HW * itemsize + 5 * C * 4),
    )

    kernel = functools.partial(_dgca_kernel, use_mxu=use_mxu)

    out = pl.pallas_call(
        kernel,
        out_shape=jax.ShapeDtypeStruct((B, C, HW), dtype),
        grid=(num_steps,),
        in_specs=[
            pl.BlockSpec(memory_space=pltpu.SMEM),                 # scalars
            pl.BlockSpec((Bt, C, HW), lambda b: (b, 0, 0)),        # x tile
            pl.BlockSpec(params.shape, lambda b: (0, 0)),          # params
        ],
        out_specs=pl.BlockSpec((Bt, C, HW), lambda b: (b, 0, 0)),
        compiler_params=pltpu.CompilerParams(
            dimension_semantics=("parallel",),
            vmem_limit_bytes=vmem_limit),
        cost_estimate=cost,
        # Opt-in only: aliasing reuses x's HBM buffer for the output (saves an
        # allocation) but clobbers the caller's input, so it is off by default.
        input_output_aliases=({1: 0} if alias_input else {}),
    )(scal, x3, params)

    return out.reshape(B, C, H, W)


def dgca_ref(x, w_mask, b_mask, w_dw, b_dw, ln_g, ln_b, alpha, beta):
    """Pure-JAX f32 reference matching the PyTorch forward."""
    B, C, H, W = x.shape
    HW = H * W
    xf = x.reshape(B, C, HW)
    # GSA
    logits = jnp.einsum("c,bcs->bs", w_mask, xf) + b_mask
    attn = jax.nn.softmax(logits, axis=-1)                   # (B, HW)
    context = jnp.einsum("bcs,bs->bc", xf, attn)             # (B, C)
    t = context * w_dw + b_dw
    mu = jnp.mean(t, axis=-1, keepdims=True)
    var = jnp.mean((t - mu) ** 2, axis=-1, keepdims=True)
    s_att = (t - mu) / jnp.sqrt(var + 1e-5) * ln_g + ln_b    # (B, C)
    s_out = x + alpha * s_att[:, :, None, None]
    # GCA
    ctx = jnp.mean(xf, axis=-1)                              # (B, C)
    attn_c = jax.nn.softmax(ctx, axis=-1)                    # (B, C)
    c_att = jnp.einsum("bc,bcs->bs", attn_c, xf)             # (B, HW)
    c_out = x + beta * c_att.reshape(B, 1, H, W)
    return s_out + c_out


if __name__ == "__main__":
    def run_case(B, C, H, W, dtype, atol, rtol):
        key = jax.random.PRNGKey(0)
        kx, k1, k2, k3, k4, k5 = jax.random.split(key, 6)
        x = jax.random.normal(kx, (B, C, H, W), dtype=jnp.float32)
        # torch initializes alpha/beta to 0; use non-zero so both attention
        # paths are actually exercised.
        w_mask = 0.1 * jax.random.normal(k1, (C,), jnp.float32)      # conv_mask.weight
        b_mask = jnp.float32(0.05)                                   # conv_mask.bias
        w_dw = 1.0 + 0.1 * jax.random.normal(k2, (C,), jnp.float32)  # depthwise weight
        b_dw = 0.1 * jax.random.normal(k3, (C,), jnp.float32)        # depthwise bias
        ln_g = 1.0 + 0.1 * jax.random.normal(k4, (C,), jnp.float32)  # LayerNorm weight
        ln_b = 0.1 * jax.random.normal(k5, (C,), jnp.float32)        # LayerNorm bias
        alpha = jnp.float32(0.5)
        beta = jnp.float32(0.7)

        x_in = x.astype(dtype)
        out = dgca_layer(x_in, w_mask, b_mask, w_dw, b_dw, ln_g, ln_b, alpha, beta)
        out = jax.block_until_ready(out)
        assert out.shape == (B, C, H, W)
        assert out.dtype == dtype

        ref = dgca_ref(x_in.astype(jnp.float32), w_mask, b_mask, w_dw, b_dw,
                       ln_g, ln_b, alpha, beta)
        outf = out.astype(jnp.float32)
        err = float(jnp.max(jnp.abs(outf - ref)))
        assert jnp.allclose(outf, ref, atol=atol, rtol=rtol), (dtype, C, H, W, err)

    # VPU path (C < 128), f32, lane-aligned HW = 256
    run_case(2, 4, 16, 16, jnp.float32, 1e-5, 1e-5)
    # VPU path, f32, unpadded HW = 50 (full-dim block; Mosaic masks the tail)
    run_case(2, 8, 5, 10, jnp.float32, 1e-5, 1e-5)
    # Odd batch: grid = cdiv(3, 2) with a partial last block
    run_case(3, 4, 16, 16, jnp.float32, 1e-5, 1e-5)
    # VPU path, native bf16 HBM I/O with f32 accumulation in the kernel
    run_case(2, 4, 16, 16, jnp.bfloat16, 5e-2, 5e-2)
    # MXU path (C >= 128): reductions as batched matmuls (default MXU matmul
    # precision on both the kernel and the f32 reference -> looser tolerance)
    run_case(2, 128, 8, 8, jnp.float32, 1e-1, 1e-1)
    # MXU path with native bf16 operands (no full-tile f32 working copy)
    run_case(2, 128, 8, 8, jnp.bfloat16, 2.5e-1, 2.5e-1)

    print("KERNEL_OK")
</pallas_src>

<mosaic_0001>
module attributes {stable_mosaic.version = 11 : i64} {
  func.func @_dgca_kernel(%arg0: i32, %arg1: memref<3xf32, #tpu.memory_space<smem>>, %arg2: memref<1x4x256xf32, #tpu.memory_space<vmem>>, %arg3: memref<4x5xf32, #tpu.memory_space<vmem>>, %arg4: memref<1x4x256xf32, #tpu.memory_space<vmem>>) attributes {dimension_semantics = [#tpu.dimension_semantics<parallel>], iteration_bounds = array<i64: 2>, scalar_prefetch = 0 : i64, scratch_operands = 0 : i64, tpu.core_type = #tpu.core_type<tc>, window_params = [{transform_indices = @transform_0, window_bounds = array<i64: 3>}, {transform_indices = @transform_1, window_bounds = array<i64: 1, 4, 256>}, {pipeline_mode = #tpu.pipeline_mode<synchronous>, transform_indices = @transform_2, window_bounds = array<i64: 4, 5>}, {transform_indices = @transform_3, window_bounds = array<i64: 1, 4, 256>}]} {
    %c0 = arith.constant 0 : index
    %c0_0 = arith.constant 0 : index
    %c0_1 = arith.constant 0 : index
    %0 = vector.load %arg2[%c0, %c0_0, %c0_1] : memref<1x4x256xf32, #tpu.memory_space<vmem>>, vector<1x4x256xf32>
    %c0_2 = arith.constant 0 : index
    %1 = memref.load %arg1[%c0_2] : memref<3xf32, #tpu.memory_space<smem>>
    %c1 = arith.constant 1 : index
    %2 = memref.load %arg1[%c1] : memref<3xf32, #tpu.memory_space<smem>>
    %c2 = arith.constant 2 : index
    %3 = memref.load %arg1[%c2] : memref<3xf32, #tpu.memory_space<smem>>
    %c0_3 = arith.constant 0 : index
    %c0_4 = arith.constant 0 : index
    %4 = vector.load %arg3[%c0_3, %c0_4] : memref<4x5xf32, #tpu.memory_space<vmem>>, vector<4x1xf32>
    %c0_5 = arith.constant 0 : index
    %c1_6 = arith.constant 1 : index
    %5 = vector.load %arg3[%c0_5, %c1_6] : memref<4x5xf32, #tpu.memory_space<vmem>>, vector<4x1xf32>
    %c0_7 = arith.constant 0 : index
    %c2_8 = arith.constant 2 : index
    %6 = vector.load %arg3[%c0_7, %c2_8] : memref<4x5xf32, #tpu.memory_space<vmem>>, vector<4x1xf32>
    %c0_9 = arith.constant 0 : index
    %c3 = arith.constant 3 : index
    %7 = vector.load %arg3[%c0_9, %c3] : memref<4x5xf32, #tpu.memory_space<vmem>>, vector<4x1xf32>
    %c0_10 = arith.constant 0 : index
    %c4 = arith.constant 4 : index
    %8 = vector.load %arg3[%c0_10, %c4] : memref<4x5xf32, #tpu.memory_space<vmem>>, vector<4x1xf32>
    %9 = vector.shape_cast %4 : vector<4x1xf32> to vector<1x4x1xf32>
    %10 = vector.broadcast %9 : vector<1x4x1xf32> to vector<1x4x256xf32>
    %11 = arith.mulf %0, %10 : vector<1x4x256xf32>
    %cst = arith.constant dense<0.000000e+00> : vector<1x256xf32>
    %12 = vector.multi_reduction <add>, %11, %cst [1] : vector<1x4x256xf32> to vector<1x256xf32>
    %13 = vector.shape_cast %12 : vector<1x256xf32> to vector<1x1x256xf32>
    %14 = vector.broadcast %1 : f32 to vector<1x1x256xf32>
    %15 = arith.addf %13, %14 : vector<1x1x256xf32>
    %cst_11 = arith.constant dense<0xFF800000> : vector<1x1xf32>
    %16 = vector.multi_reduction <maximumf>, %15, %cst_11 [2] : vector<1x1x256xf32> to vector<1x1xf32>
    %17 = vector.shape_cast %16 : vector<1x1xf32> to vector<1x1x1xf32>
    %18 = vector.broadcast %17 : vector<1x1x1xf32> to vector<1x1x256xf32>
    %19 = arith.subf %15, %18 : vector<1x1x256xf32>
    %20 = math.exp %19 : vector<1x1x256xf32>
    %cst_12 = arith.constant dense<0.000000e+00> : vector<1x1xf32>
    %21 = vector.multi_reduction <add>, %20, %cst_12 [2] : vector<1x1x256xf32> to vector<1x1xf32>
    %22 = vector.shape_cast %21 : vector<1x1xf32> to vector<1x1x1xf32>
    %cst_13 = arith.constant 1.000000e+00 : f32
    %23 = vector.broadcast %cst_13 : f32 to vector<1x1x1xf32>
    %24 = arith.divf %23, %22 : vector<1x1x1xf32>
    %25 = vector.broadcast %24 : vector<1x1x1xf32> to vector<1x1x256xf32>
    %26 = arith.mulf %20, %25 : vector<1x1x256xf32>
    %27 = vector.broadcast %26 : vector<1x1x256xf32> to vector<1x4x256xf32>
    %28 = arith.mulf %0, %27 : vector<1x4x256xf32>
    %cst_14 = arith.constant dense<0.000000e+00> : vector<1x4xf32>
    %29 = vector.multi_reduction <add>, %28, %cst_14 [2] : vector<1x4x256xf32> to vector<1x4xf32>
    %30 = vector.shape_cast %29 : vector<1x4xf32> to vector<1x4x1xf32>
    %31 = vector.shape_cast %5 : vector<4x1xf32> to vector<1x4x1xf32>
    %32 = arith.mulf %30, %31 : vector<1x4x1xf32>
    %33 = vector.shape_cast %6 : vector<4x1xf32> to vector<1x4x1xf32>
    %34 = arith.addf %32, %33 : vector<1x4x1xf32>
    %cst_15 = arith.constant dense<0.000000e+00> : vector<1x1xf32>
    %35 = vector.multi_reduction <add>, %34, %cst_15 [1] : vector<1x4x1xf32> to vector<1x1xf32>
    %36 = vector.shape_cast %35 : vector<1x1xf32> to vector<1x1x1xf32>
    %cst_16 = arith.constant 4.000000e+00 : f32
    %37 = vector.broadcast %cst_16 : f32 to vector<1x1x1xf32>
    %38 = arith.divf %36, %37 : vector<1x1x1xf32>
    %39 = vector.broadcast %38 : vector<1x1x1xf32> to vector<1x4x1xf32>
    %40 = arith.subf %34, %39 : vector<1x4x1xf32>
    %41 = arith.mulf %40, %40 : vector<1x4x1xf32>
    %cst_17 = arith.constant dense<0.000000e+00> : vector<1x1xf32>
    %42 = vector.multi_reduction <add>, %41, %cst_17 [1] : vector<1x4x1xf32> to vector<1x1xf32>
    %43 = vector.shape_cast %42 : vector<1x1xf32> to vector<1x1x1xf32>
    %cst_18 = arith.constant 4.000000e+00 : f32
    %44 = vector.broadcast %cst_18 : f32 to vector<1x1x1xf32>
    %45 = arith.divf %43, %44 : vector<1x1x1xf32>
    %46 = vector.broadcast %38 : vector<1x1x1xf32> to vector<1x4x1xf32>
    %47 = arith.subf %34, %46 : vector<1x4x1xf32>
    %cst_19 = arith.constant 9.99999974E-6 : f32
    %48 = vector.broadcast %cst_19 : f32 to vector<1x1x1xf32>
    %49 = arith.addf %45, %48 : vector<1x1x1xf32>
    %50 = math.rsqrt %49 : vector<1x1x1xf32>
    %51 = vector.broadcast %50 : vector<1x1x1xf32> to vector<1x4x1xf32>
    %52 = arith.mulf %47, %51 : vector<1x4x1xf32>
    %53 = vector.shape_cast %7 : vector<4x1xf32> to vector<1x4x1xf32>
    %54 = arith.mulf %52, %53 : vector<1x4x1xf32>
    %55 = vector.shape_cast %8 : vector<4x1xf32> to vector<1x4x1xf32>
    %56 = arith.addf %54, %55 : vector<1x4x1xf32>
    %57 = vector.broadcast %2 : f32 to vector<1x4x1xf32>
    %58 = arith.mulf %57, %56 : vector<1x4x1xf32>
    %cst_20 = arith.constant dense<0.000000e+00> : vector<1x4xf32>
    %59 = vector.multi_reduction <add>, %0, %cst_20 [2] : vector<1x4x256xf32> to vector<1x4xf32>
    %60 = vector.shape_cast %59 : vector<1x4xf32> to vector<1x4x1xf32>
    %cst_21 = arith.constant 3.906250e-03 : f32
    %61 = vector.broadcast %cst_21 : f32 to vector<1x4x1xf32>
    %62 = arith.mulf %60, %61 : vector<1x4x1xf32>
    %cst_22 = arith.constant dense<0xFF800000> : vector<1x1xf32>
    %63 = vector.multi_reduction <maximumf>, %62, %cst_22 [1] : vector<1x4x1xf32> to vector<1x1xf32>
    %64 = vector.shape_cast %63 : vector<1x1xf32> to vector<1x1x1xf32>
    %65 = vector.broadcast %64 : vector<1x1x1xf32> to vector<1x4x1xf32>
    %66 = arith.subf %62, %65 : vector<1x4x1xf32>
    %67 = math.exp %66 : vector<1x4x1xf32>
    %cst_23 = arith.constant dense<0.000000e+00> : vector<1x1xf32>
    %68 = vector.multi_reduction <add>, %67, %cst_23 [1] : vector<1x4x1xf32> to vector<1x1xf32>
    %69 = vector.shape_cast %68 : vector<1x1xf32> to vector<1x1x1xf32>
    %cst_24 = arith.constant 1.000000e+00 : f32
    %70 = vector.broadcast %cst_24 : f32 to vector<1x1x1xf32>
    %71 = arith.divf %70, %69 : vector<1x1x1xf32>
    %72 = vector.broadcast %71 : vector<1x1x1xf32> to vector<1x4x1xf32>
    %73 = arith.mulf %67, %72 : vector<1x4x1xf32>
    %74 = vector.broadcast %73 : vector<1x4x1xf32> to vector<1x4x256xf32>
    %75 = arith.mulf %0, %74 : vector<1x4x256xf32>
    %cst_25 = arith.constant dense<0.000000e+00> : vector<1x256xf32>
    %76 = vector.multi_reduction <add>, %75, %cst_25 [1] : vector<1x4x256xf32> to vector<1x256xf32>
    %77 = vector.shape_cast %76 : vector<1x256xf32> to vector<1x1x256xf32>
    %78 = vector.broadcast %3 : f32 to vector<1x1x256xf32>
    %79 = arith.mulf %78, %77 : vector<1x1x256xf32>
    %cst_26 = arith.constant 2.000000e+00 : f32
    %80 = vector.broadcast %cst_26 : f32 to vector<1x4x256xf32>
    %81 = arith.mulf %0, %80 : vector<1x4x256xf32>
    %82 = vector.broadcast %58 : vector<1x4x1xf32> to vector<1x4x256xf32>
    %83 = vector.broadcast %79 : vector<1x1x256xf32> to vector<1x4x256xf32>
    %84 = arith.addf %82, %83 : vector<1x4x256xf32>
    %85 = arith.addf %81, %84 : vector<1x4x256xf32>
    %c0_27 = arith.constant 0 : index
    %c0_28 = arith.constant 0 : index
    %c0_29 = arith.constant 0 : index
    %86 = vector.load %arg4[%c0_27, %c0_28, %c0_29] : memref<1x4x256xf32, #tpu.memory_space<vmem>>, vector<1x4x256xf32>
    tpu.vector_store %arg4[%c0_27, %c0_28, %c0_29], %85 {strides = array<i32>} : memref<1x4x256xf32, #tpu.memory_space<vmem>>, vector<1x4x256xf32>,
    return
  }
  func.func @transform_0(%arg0: i32) -> i32 {
    %c0_i32 = arith.constant 0 : i32
    %c0_i32_0 = arith.constant 0 : i32
    return %c0_i32 : i32
  }
  func.func @transform_1(%arg0: i32) -> (i32, i32, i32) {
    %c0_i32 = arith.constant 0 : i32
    %c0_i32_0 = arith.constant 0 : i32
    %c0_i32_1 = arith.constant 0 : i32
    return %arg0, %c0_i32, %c0_i32_0 : i32, i32, i32
  }
  func.func @transform_2(%arg0: i32) -> (i32, i32) {
    %c0_i32 = arith.constant 0 : i32
    %c0_i32_0 = arith.constant 0 : i32
    %c0_i32_1 = arith.constant 0 : i32
    return %c0_i32, %c0_i32_0 : i32, i32
  }
  func.func @transform_3(%arg0: i32) -> (i32, i32, i32) {
    %c0_i32 = arith.constant 0 : i32
    %c0_i32_0 = arith.constant 0 : i32
    %c0_i32_1 = arith.constant 0 : i32
    return %arg0, %c0_i32, %c0_i32_0 : i32, i32, i32
  }
}

</mosaic_0001>

<bundles_post_ra>
// kernel: tpu_custom_call.1
= control target key start
LH: loop header
LB: loop body
LE: loop exit
PB: predicated region body
PF: predicated region fallthrough
CT: control target
= control target key end

     0   :  { %8 = vsyncpa [#allocation5], 0  ;;  %s959_s0 = inlined_call_operand.hbm [shape: f32[3], index: 0, kind: input, shape index: {}]   ;;  %s960_s1 = inlined_call_operand.hbm [shape: f32[2,4,256], index: 1, kind: input, shape index: {}]   ;;  %s961_s2 = inlined_call_operand.vmem [shape: f32[4,5], index: 2, kind: input, shape index: {}]   ;;  %s962_s3 = inlined_call_operand.hbm [shape: f32[2,4,256], index: 3, kind: output, shape index: {}]  }
   0x1   :  { %9 = vsyncpa [#allocation3], 0 }
   0x2   :  { %11 = vsyncpa [#allocation3 + $0x1], 0 }
   0x3   :  { %12 = vsyncpa [#allocation4], 0 }
   0x4   :  { %14 = vsyncpa [#allocation4 + $0x1], 0  ;;  %s717_s12 = smov 0   ;;  %s719_s13 = smov 0  }
   0x5   :  { %s721_s14 = smov 0   ;;  %s723_s15 = smov 0  }
   0x6 LB: > { %s738_s16 = sadd.s32 4294967295, %s686_s15   ;;  %s475_s17 = sadd.s32 4294967294, %s686_s15   ;;  %s686_s15 = sphi %s723_s15, %s983_s15   ;;  %s682_s14 = sphi %s721_s14, %s982_s14   ;;  %s678_s13 = sphi %s719_s13, %s981_s13   ;;  %s674_s12 = sphi %s717_s12, %s980_s12  }
   0x7   : > { %p61_p0 = scmp.ne.s32.totalorder %s678_s13, %s674_s12  ;;  %p963_p1 = scmp.eq.s32.totalorder %s738_s16, 0 }
   0x8   : > { %p112_p3 = scmp.eq.s32.totalorder %s475_s17, 1  ;;  %p476_p5 = scmp.ge.s32.totalorder %s686_s15, 1 }
   0x9   : > { %p747_p4 = por %p963_p1, %p61_p0  ;;  %p119_p7 = scmp.lt.s32.totalorder %s686_s15, 3 }
   0xa   : > { %p752_p6 = por %p112_p3, %p61_p0  ;;  %s763_s21 = sadd.s32 1, %s686_s15  }
   0xb   : > { %s966_s18 = scalar_select %p747_p4, 1, 0 }
   0xc   : > { %s967_s19 = scalar_select %p752_p6, 1, 0 }
   0xd   : > { %p757_p8 = pnand %p476_p5, %p119_p7  ;;  %s45_s22 = ssub.s32 %s686_s15, %s763_s21 }
   0xe   : > { %s48_s23 = sadd.s32 1, %s682_s14  ;;  %p776_p12 = scmp.eq.s32.totalorder %s45_s22, 0 }
   0xf   : > { %p503_p10 = pneg %p757_p8  ;;  %p55_p13 = scmp.ne.s32.totalorder %s682_s14, %s678_s13 }
  0x10   : > { %p56_p0 = scmp.eq.s32.totalorder %s686_s15, 0  ;;  %p516_p3 = scmp.lt.s32.totalorder %s686_s15, 2 }
  0x11   : > { %p772_p11 = pnand %p503_p10, %p963_p1  ;;  %s573_s28 = scalar_lea.hbm %s959_s0, 16 }
  0x12   : > { %p574_p5 = scmp.ne.s32.totalorder %s959_s0, %s573_s28  ;;  %p580_p1 = scmp.lt.u32.totalorder %s573_s28, %s959_s0 }
  0x13   : > { %p575_p7 = pneg %p772_p11 }
  0x15   : > { %p576_p10 = pnand %p575_p7, %p574_p5 }
  0x17   : > { %p577_p9 = pneg %p576_p10 }
  0x19   : > { %p582_p2 = pnand %p580_p1, %p577_p9 }
  0x1b   : > { %585 = shalt.err (!%p582_p2)
}
  0x1c   : > { %s688_s6 = smov [#allocation2]   ;;  %p57_p1 = por %p56_p0, %p55_p13 }
  0x1d   : > { %506 = dma.hbm_to_smem (!%p772_p11), %s959_s0, 16, %s688_s6, [#allocation5]  }
  0x1e   : > { %s803_s9 = scalar_select %p776_p12, %s682_s14, %s48_s23  }
  0x1f   : > { %p971_p2 = scmp.eq.s32.totalorder %s738_s16, 1  ;;  %s144_s11 = sand.u32 1, %s682_s14  }
  0x20   : > { %s493_s17 = sshll.u32 %s686_s15, 7  ;;  %s479_s22 = sshll.u32 %s144_s11, 3 }
  0x21   : > { %p815_p9 = por %p971_p2, %p55_p13  ;;  %s824_s27 = scalar_lea.hbm %s960_s1, %s493_s17 }
  0x22   : > { %s148_s23 = scalar_lea.vmem [#allocation6], %s479_s22  ;;  %p828_p11 = pnand %p516_p3, %p57_p1 }
  0x23   : > { %s972_s10 = scalar_select %p815_p9, 1, 0 }
  0x24   : > { %s156_s25 = sshll.u32 %s148_s23, 4  ;;  %s145_s29 = scalar_lea.sflag [#allocation3], %s144_s11  ;;  %s832_s25 = int_to_ptr.vmem [resolvable:$true] %s156_s25 }
  0x25   : > { %s586_s30 = scalar_lea.hbm %s824_s27, 128  ;;  %p588_p13 = pneg %p828_p11 }
  0x26   : > { %p587_p12 = scmp.ne.s32.totalorder %s824_s27, %s586_s30  ;;  %s591_s6 = scalar_lea.hbm %s960_s1, 256 }
  0x27   : > { %p592_p3 = scmp.lt.u32.totalorder %s824_s27, %s960_s1  ;;  %p593_p7 = scmp.lt.u32.totalorder %s591_s6, %s586_s30 }
  0x28   : > { %p589_p0 = pnand %p588_p13, %p587_p12  ;;  %p595_p1 = scmp.lt.u32.totalorder %s586_s30, %s824_s27 }
  0x29   : > { %p594_p10 = por %p593_p7, %p592_p3 }
  0x2a   : > { %p590_p5 = pneg %p589_p0 }
  0x2b   : > { %p596_p2 = por %p595_p1, %p594_p10 }
  0x2d   : > { %p597_p6 = pnand %p596_p2, %p590_p5 }
  0x2f   : > { %600 = shalt.err (!%p597_p6)
}
  0x30   : > { %s601_s11 = scalar_lea.vmem %s832_s25, 128  ;;  %s689_s17 = smov [#allocation6]  }
  0x31   : > { %p602_p12 = scmp.ne.s32.totalorder %s832_s25, %s601_s11  ;;  %s606_s22 = sshll.u32 %s689_s17, 4  ;;  %s607_s22 = int_to_ptr.vmem [resolvable:$false] %s606_s22 }
  0x32   : > { %s608_s24 = scalar_lea.vmem %s607_s22, 256  ;;  %p609_p4 = scmp.lt.s32.totalorder %s832_s25, %s607_s22 }
  0x33   : > { %p604_p0 = pnand %p602_p12, %p588_p13  ;;  %p610_p3 = scmp.lt.s32.totalorder %s608_s24, %s601_s11 }
  0x35   : > { %p605_p9 = pneg %p604_p0  ;;  %p611_p7 = por %p610_p3, %p609_p4 }
  0x37   : > { %p612_p10 = pnand %p611_p7, %p605_p9 }
  0x39   : > { %615 = shalt.err (!%p612_p10)
}
  0x3a   : > { %510 = dma.hbm_to_vmem [thread:$0]  (!%p828_p11), %s824_s27, 128, %s832_s25, %s145_s29  }
  0x3b   : > { %165 = sbr.rel (%p757_p8) target bundleno = 901 (0x385), region = 32  ;;  %p974_p6 = scmp.eq.s32.totalorder (!%p757_p8), %s738_s16, 0 }
  0x42   : > { %661 = dma.done.wait (%p974_p6), [#allocation5], 16   ;;  %p975_p13 = pmov %p974_p6 }
  0x43   : > { %s866_s26 = sand.u32 1, %s678_s13   ;;  %p976_p4 = scmp.ne.s32.totalorder %s966_s18, 0 }
  0x44   : > { %663 = vsyncadd (%p975_p13), [#allocation5], 4294967280  ;;  %s484_s23 = sshll.u32 %s866_s26, 3  ;;  %s172_s28 = scalar_lea.sflag [#allocation3], %s866_s26 }
  0x45   : > { %s175_s27 = scalar_lea.vmem [#allocation6], %s484_s23 }
  0x46   : > { %665 = dma.done.wait (%p976_p4), %s172_s28, 128  }
  0x47   : > { %667 = vsyncadd (%p976_p4), %s172_s28, 4294967168 }
  0x48   : > { %180 = sfence }
  0x49   : > { %v879_v0 = vld [vmem:[%s961_s2] sm:$0xf]  ;;  %v690_v1 = vmov 0   ;;  %v691_v2 = vmov 839922192   ;;  %v211_v4 = vlaneseq  ;;  %v884_v9 = vld [vmem:[%s175_s27] sm:$0xff] }
  0x4a   : > { %558 = vset.pattern.permute.xlu0 %v690_v1  ;;  %v209_v3 = vunpack.c.l.s4 %v691_v2  ;;  %vm220_vm0 = vcmask 1043456   ;;  %s200_s18 = sld [smem:[#allocation2]]  ;;  %s692_s29 = smov 126   ;;  %v306_v49 = vcombine.high %v884_v9, %v884_v9  ;;  %v695_v53 = vmov 1  }
  0x4b   : > { %206 = vperm.xlu0 %558, %v879_v0   ;;  %v212_v6 = vshrl.u32 %v211_v4, 7  ;;  %s693_s30 = smov 125   ;;  %s694_s4 = smov 127   ;;  %v308_v50 = vsel %vm220_vm0, %v884_v9, 0.0  ;;  %vm272_vm1 = vcmask 11272  }
  0x4c   : > { %v210_v5 = vunpack.c.0.s8 %v209_v3  ;;  %v309_v51 = vsel %vm220_vm0, %v306_v49, 0.0  ;;  %s486_s5 = sld [smem:[#allocation2 + $0x1]]  ;;  %s487_s6 = sld [smem:[#allocation2 + $0x2]] }
  0x4d   : > { %v310_v52 = vadd.f32 %v309_v51, %v308_v50  ;;  %s494_s7 = sshll.u32 %s738_s16, 7  ;;  %s198_s8 = scalar_lea.vmem [#allocation7], %s484_s23 }
  0x4e   : > { %v882_v7 = vsub.s32 %v210_v5, %v212_v6  ;;  %s393_s11 = sshll.u32 %s198_s8, 4  ;;  %s915_s24 = scalar_lea.hbm %s962_s3, %s494_s7  ;;  %s917_s11 = int_to_ptr.vmem [resolvable:$true] %s393_s11 }
  0x4f   : > { %559 = vset.pattern.permute.xlu0 %v695_v53  ;;  %s379_s28 = scalar_lea.sflag [#allocation4], %s866_s26  ;;  %s616_s27 = scalar_lea.vmem %s917_s11, 128 }
  0x50   : > { %v235_v26 = vstv %s200_s18  ;;  %p617_p8 = scmp.ne.s32.totalorder %s917_s11, %s616_s27  ;;  %p977_p9 = scmp.ne.s32.totalorder %s972_s10, 0 }
  0x51   : > { %s696_s16 = smov [#allocation7]  }
  0x52   : > { %p618_p11 = pnand %p617_p8, %p977_p9  ;;  %s620_s23 = sshll.u32 %s696_s16, 4  ;;  %s621_s23 = int_to_ptr.vmem [resolvable:$false] %s620_s23 }
  0x53   : > { %s622_s20 = scalar_lea.vmem %s621_s23, 256  ;;  %p623_p1 = scmp.lt.s32.totalorder %s917_s11, %s621_s23 }
  0x54   : > { %p619_p5 = pneg %p618_p11  ;;  %p624_p2 = scmp.lt.s32.totalorder %s622_s20, %s616_s27 }
  0x56   : > { %p625_p12 = por %p624_p2, %p623_p1 }
  0x58   : > { %p626_p0 = pnand %p625_p12, %p619_p5 }
  0xca   : > { %v207_v8 = vpop.permute.xlu0 %206 }
  0xcb   : > { %v214_v10 = vrot.slane %v207_v8, %v882_v7 }
  0xcd   : > { %v216_v11 = vmul.f32 %v214_v10, %v884_v9 }
  0xcf   : > { %v218_v12 = vcombine.high %v216_v11, %v216_v11  ;;  %v221_v13 = vsel %vm220_vm0, %v216_v11, 0.0 }
  0xd0   : > { %v222_v14 = vrot.slane %v221_v13, 4 }
  0xd1   : > { %v228_v15 = vsel %vm220_vm0, %v218_v12, 0.0 }
  0xd2   : > { %v223_v16 = vadd.f32 %v222_v14, %v221_v13  ;;  %v229_v17 = vrot.slane %v228_v15, 4 }
  0xd4   : > { %v224_v18 = vrot.slane %v223_v16, 2  ;;  %v230_v19 = vadd.f32 %v229_v17, %v228_v15 }
  0xd6   : > { %v225_v20 = vadd.f32 %v224_v18, %v223_v16  ;;  %v231_v21 = vrot.slane %v230_v19, 2 }
  0xd8   : > { %v226_v22 = vrot.slane %v225_v20, 1  ;;  %v232_v23 = vadd.f32 %v231_v21, %v230_v19 }
  0xda   : > { %v227_v24 = vadd.f32 %v226_v22, %v225_v20  ;;  %v233_v25 = vrot.slane %v232_v23, 1  ;;  %v303_v22 = vstv %s486_s5 }
  0xdc   : > { %v234_v27 = vadd.f32 %v233_v25, %v232_v23  ;;  %v236_v28 = vadd.f32 %v235_v26, %v227_v24 }
  0xde   : > { %v237_v29 = vadd.f32 %v235_v26, %v234_v27 }
  0xe0   : > { %v238_v30 = vmax.f32 %v236_v28, %v237_v29 }
  0xe2   : > { %239 = vmax.xlane.f32.xlu0 %v238_v30 }
  0xf8   : > { %295 = vrot.lane.b32.xlu0 %v879_v0, %s692_s29 }
  0xfc   : > { %299 = vrot.lane.b32.xlu0 %v879_v0, %s693_s30 }
 0x16f   : > { %v240_v31 = vpop.xlane.xlu0 %239 }
 0x170   : > { %v241_v32 = vsub.f32 %v236_v28, %v240_v31  ;;  %v242_v33 = vsub.f32 %v237_v29, %v240_v31 }
 0x172   : > { %v243_v34 = vmul.f32 1.442695, %v241_v32  ;;  %v245_v35 = vmul.f32 1.442695, %v242_v33 }
 0x173   : > { %v296_v15 = vpop.permute.xlu0 %295 }
 0x174   : > { %561 = vpow2.f32 %v243_v34 }
 0x175   : > { %563 = vpow2.f32 %v245_v35 }
 0x177   : > { %v300_v20 = vpop.permute.xlu0 %299 }
 0x17e   : > { %v562_v36 = vpop.eup %561 }
 0x17f   : > { %v564_v37 = vpop.eup %563 }
 0x180   : > { %v247_v38 = vadd.f32 %v564_v37, %v562_v36 }
 0x182   : > { %248 = vadd.xlane.f32.xlu1 %v247_v38 }
 0x20f   : > { %v249_v39 = vpop.xlane.xlu1 %248 }
 0x210   : > { %565 = vrcp.f32 %v249_v39 }
 0x21a   : > { %v566_v40 = vpop.eup %565 }
 0x21b   : > { %v252_v41 = vmul.f32 %v566_v40, %v562_v36  ;;  %v253_v42 = vmul.f32 %v566_v40, %v564_v37 }
 0x21d   : > { %v256_v43 = vcombine.low %v252_v41, %v253_v42 }
 0x21f   : > { %v258_v44 = vmul.f32 %v256_v43, %v884_v9 }
 0x221   : > { %v260_v45 = vcombine.high %v258_v44, %v258_v44  ;;  %v262_v46 = vsel %vm220_vm0, %v258_v44, 0.0 }
 0x223   : > { %v263_v47 = vsel %vm220_vm0, %v260_v45, 0.0 }
 0x224   : > { %v264_v48 = vadd.f32 %v263_v47, %v262_v46 }
 0x226   : > { %265 = vadd.xlane.f32.xlu1 %v264_v48 }
 0x237   : > { %268 = vrot.lane.b32.xlu1 %v879_v0, %s694_s4 }
 0x25b   : > { %311 = vadd.xlane.f32.xlu1 %v310_v52 }
 0x2b3   : > { %v266_v54 = vpop.xlane.xlu1 %265 }
 0x2b4   : > { %v267_v55 = vmul.f32 %v266_v54, %v879_v0 }
 0x2b7   : > { %v269_v56 = vpop.permute.xlu1 %268 }
 0x2b8   : > { %v271_v57 = vadd.f32 %v269_v56, %v267_v55 }
 0x2ba   : > { %v273_v58 = vsel %vm272_vm1, %v271_v57, 0.0 }
 0x2bb   : > { %v274_v59 = vrot.slane %v273_v58, 4 }
 0x2bd   : > { %v275_v60 = vadd.f32 %v274_v59, %v273_v58 }
 0x2bf   : > { %v276_v61 = vrot.slane %v275_v60, 2 }
 0x2c1   : > { %v277_v62 = vadd.f32 %v276_v61, %v275_v60  ;;  %v361_v60 = vstv %s487_s6 }
 0x2c3   : > { %v278_v63 = vrot.slane %v277_v62, 1 }
 0x2c5   : > { %v279_v1 = vadd.f32 %v278_v63, %v277_v62 }
 0x2c7   : > { %v281_v2 = vmul.f32 0.25, %v279_v1  ;;  %v364_v1 = vmul.f32 2.0, %v884_v9 }
 0x2c9   : > { %v282_v3 = vsub.f32 %v271_v57, %v281_v2 }
 0x2cb   : > { %v283_v4 = vmul.f32 %v282_v3, %v282_v3 }
 0x2cd   : > { %v284_v5 = vsel %vm272_vm1, %v283_v4, 0.0 }
 0x2ce   : > { %v285_v6 = vrot.slane %v284_v5, 4 }
 0x2d0   : > { %v286_v8 = vadd.f32 %v285_v6, %v284_v5 }
 0x2d2   : > { %v287_v10 = vrot.slane %v286_v8, 2 }
 0x2d4   : > { %v288_v11 = vadd.f32 %v287_v10, %v286_v8 }
 0x2d6   : > { %v289_v12 = vrot.slane %v288_v11, 1 }
 0x2d8   : > { %v290_v0 = vadd.f32 %v289_v12, %v288_v11 }
 0x2da   : > { %v291_v13 = vmul.f32 0.25, %v290_v0 }
 0x2dc   : > { %v292_v14 = vadd.f32 1e-05, %v291_v13 }
 0x2de   : > { %567 = vrsqrt.f32 %v292_v14 }
 0x2e8   : > { %v568_v16 = vpop.eup %567  ;;  %v312_v17 = vpop.xlane.xlu1 %311 }
 0x2e9   : > { %v294_v18 = vmul.f32 %v568_v16, %v282_v3  ;;  %v313_v19 = vmul.f32 0.00390625, %v312_v17 }
 0x2eb   : > { %v298_v21 = vmul.f32 %v296_v15, %v294_v18  ;;  %v314_v23 = vsel %vm220_vm0, %v313_v19, -inf }
 0x2ec   : > { %v315_v26 = vrot.slane %v314_v23, 4 }
 0x2ed   : > { %v302_v24 = vadd.f32 %v300_v20, %v298_v21 }
 0x2ee   : > { %v316_v27 = vmax.f32 %v314_v23, %v315_v26 }
 0x2ef   : > { %v304_v25 = vmul.f32 %v303_v22, %v302_v24 }
 0x2f0   : > { %v317_v28 = vrot.slane %v316_v27, 2 }
 0x2f1   : > { %367 = vperm.xlu0 %559, %v304_v25  }
 0x2f2   : > { %v318_v29 = vmax.f32 %v316_v27, %v317_v28 }
 0x2f4   : > { %v319_v30 = vrot.slane %v318_v29, 1 }
 0x2f6   : > { %v320_v31 = vmax.f32 %v318_v29, %v319_v30 }
 0x2f8   : > { %v321_v32 = vsub.f32 %v313_v19, %v320_v31 }
 0x2fa   : > { %v322_v33 = vmul.f32 1.442695, %v321_v32 }
 0x2fc   : > { %569 = vpow2.f32 %v322_v33 }
 0x306   : > { %v570_v34 = vpop.eup %569 }
 0x307   : > { %v324_v35 = vsel %vm220_vm0, %v570_v34, 0.0 }
 0x308   : > { %v325_v36 = vrot.slane %v324_v35, 4 }
 0x30a   : > { %v326_v37 = vadd.f32 %v325_v36, %v324_v35 }
 0x30c   : > { %v327_v38 = vrot.slane %v326_v37, 2 }
 0x30e   : > { %v328_v39 = vadd.f32 %v327_v38, %v326_v37 }
 0x310   : > { %v329_v40 = vrot.slane %v328_v39, 1 }
 0x312   : > { %v330_v41 = vadd.f32 %v329_v40, %v328_v39 }
 0x314   : > { %571 = vrcp.f32 %v330_v41 }
 0x31e   : > { %v572_v42 = vpop.eup %571 }
 0x31f   : > { %v333_v43 = vmul.f32 %v572_v42, %v570_v34 }
 0x321   : > { %v341_v44 = vrot.slane %v333_v43, %v882_v7 }
 0x323   : > { %v343_v45 = vmul.f32 %v341_v44, %v884_v9 }
 0x325   : > { %v345_v46 = vcombine.high %v343_v45, %v343_v45  ;;  %v347_v47 = vsel %vm220_vm0, %v343_v45, 0.0 }
 0x326   : > { %v348_v49 = vrot.slane %v347_v47, 4 }
 0x327   : > { %v354_v48 = vsel %vm220_vm0, %v345_v46, 0.0 }
 0x328   : > { %v355_v50 = vrot.slane %v354_v48, 4  ;;  %v349_v51 = vadd.f32 %v348_v49, %v347_v47 }
 0x32a   : > { %v356_v52 = vadd.f32 %v355_v50, %v354_v48  ;;  %v350_v53 = vrot.slane %v349_v51, 2 }
 0x32c   : > { %v357_v54 = vrot.slane %v356_v52, 2  ;;  %v351_v55 = vadd.f32 %v350_v53, %v349_v51 }
 0x32e   : > { %v358_v56 = vadd.f32 %v357_v54, %v356_v52  ;;  %v352_v57 = vrot.slane %v351_v55, 1 }
 0x330   : > { %v359_v7 = vrot.slane %v358_v56, 1  ;;  %v353_v58 = vadd.f32 %v352_v57, %v351_v55 }
 0x332   : > { %v360_v59 = vadd.f32 %v359_v7, %v358_v56  ;;  %v362_v61 = vmul.f32 %v361_v60, %v353_v58 }
 0x334   : > { %v363_v62 = vmul.f32 %v361_v60, %v360_v59 }
 0x370   : > { %v368_v63 = vpop.permute.xlu0 %367 }
 0x371   : > { %v370_v2 = vadd.f32 %v368_v63, %v362_v61  ;;  %v371_v3 = vadd.f32 %v368_v63, %v363_v62 }
 0x373   : > { %v374_v4 = vcombine.low %v370_v2, %v371_v3 }
 0x375   : > { %v376_v5 = vadd.f32 %v374_v4, %v364_v1 }
 0x377   : > { %377 = vst [vmem:[%s198_s8] sm:$0xff] %v376_v5 }
 0x378   : > { %629 = shalt.err (!%p626_p0)
}
 0x379   : > { %s630_s26 = scalar_lea.hbm %s915_s24, 128  ;;  %s634_s29 = scalar_lea.hbm %s962_s3, 256 }
 0x37a   : > { %p631_p3 = scmp.ne.s32.totalorder %s915_s24, %s630_s26  ;;  %p635_p6 = scmp.lt.u32.totalorder %s915_s24, %s962_s3 }
 0x37b   : > { %p636_p13 = scmp.lt.u32.totalorder %s634_s29, %s630_s26  ;;  %p638_p8 = scmp.lt.u32.totalorder %s630_s26, %s915_s24 }
 0x37c   : > { %p632_p7 = pnand %p631_p3, %p977_p9 }
 0x37d   : > { %p637_p4 = por %p636_p13, %p635_p6 }
 0x37e   : > { %p633_p10 = pneg %p632_p7 }
 0x37f   : > { %p639_p11 = por %p638_p8, %p637_p4 }
 0x381   : > { %p640_p5 = pnand %p639_p11, %p633_p10 }
 0x383   : > { %643 = shalt.err (!%p640_p5)
}
 0x384   : > { %501 = dma.vmem_to_hbm [thread:$0]  (%p977_p9), %s917_s11, 128, %s915_s24, %s379_s28  }
 0x385 PF: > { %s405_s5 = sand.u32 1, %s674_s12   ;;  %p978_p1 = scmp.ne.s32.totalorder %s967_s19, 0 }
 0x386   : > { %p979_p2 = scmp.ge.s32.totalorder %s686_s15, 2  ;;  %s406_s6 = scalar_lea.sflag [#allocation4], %s405_s5 }
 0x388   : > { %p512_p12 = pnand %p979_p2, %p978_p1 }
 0x38a   : > { %669 = dma.done.wait (!%p512_p12), %s406_s6, 128  }
 0x38b   : > { %671 = vsyncadd (!%p512_p12), %s406_s6, 4294967168  ;;  %p17_p0 = scmp.ge.s32.totalorder %s763_s21, 4   ;;  %s980_s12 = smov %s678_s13 }
 0x38c   : > { %s981_s13 = smov %s682_s14  ;;  %s982_s14 = smov %s803_s9 }
 0x38d   : > { %s983_s15 = smov %s763_s21  ;;  %19 = sbr.rel (!%p17_p0) target bundleno = 6 (0x6), region = 82 }
 0x394   :  { %411 = vsyncpa [#allocation3], 1 }
 0x395   :  { %413 = vsyncpa [#allocation3 + $0x1], 1 }
 0x396   :  { %414 = vsyncpa [#allocation4], 1 }
 0x397   :  { %416 = vsyncpa [#allocation4 + $0x1], 1 }
 0x398   :  { %417 = vsyncpa [#allocation5], 1 }
 0x399   :  { %419 = vsyncpa [#allocation5 + $0x1], 1 }

</bundles_post_ra>
